<compile_context>
chip_gen: v7x
topology: tpu7x:2x2x1
jax: 0.10.0
libtpu: 0.0.40
codegen_flags: <defaults>
</compile_context>

<pallas_src>
import jax
import jax.numpy as jnp
from jax.experimental import pallas as pl
from jax.experimental.pallas import tpu as pltpu

LANE = 128
SUBLANE = 8


def _round_up(n, m):
    return ((n + m - 1) // m) * m


def _pad2d(a, rows, cols):
    r, c = a.shape
    return jnp.pad(a, ((0, rows - r), (0, cols - c)))


def vae_kernel(
    x_ref, eps_ref,
    w1_ref, b1_ref, w2_ref, b2_ref,
    wmu_ref, bmu_ref, wlv_ref, blv_ref,
    w4_ref, b4_ref, w5_ref, b5_ref, w6_ref, b6_ref,
    recon_ref, mu_ref, logvar_ref,
):
    f32 = jnp.float32
    bf16 = jnp.bfloat16

    def linear(a, w_ref, b_ref):
        # bf16 MXU inputs, f32 accumulation, f32 bias add on the VPU.
        return jnp.dot(a.astype(bf16), w_ref[...], preferred_element_type=f32) + b_ref[...]

    x = x_ref[...]

    # ---- encode ----
    h = jnp.maximum(linear(x, w1_ref, b1_ref), 0.0)      # relu(fc1)
    h = jnp.maximum(linear(h, w2_ref, b2_ref), 0.0)      # relu(fc2); dropout = id (eval)
    mu = linear(h, wmu_ref, bmu_ref)
    logvar = linear(h, wlv_ref, blv_ref)

    # ---- reparameterize (f32 VPU; exp goes to the otherwise-idle EUP slot) ----
    z = mu + eps_ref[...] * jnp.exp(0.5 * logvar)

    # ---- decode ----
    d = jnp.maximum(linear(z, w4_ref, b4_ref), 0.0)      # relu(fc4); dropout = id
    d = jnp.maximum(linear(d, w5_ref, b5_ref), 0.0)      # relu(fc5); dropout = id
    recon = linear(d, w6_ref, b6_ref)                    # fc6

    recon_ref[...] = recon
    mu_ref[...] = mu
    logvar_ref[...] = logvar


def init_params(key, input_dim, latent_dim):
    """Deterministic parameter init. Weights stored as (in, out); biases (1, out)."""
    dims = [
        ("w1", input_dim, 128), ("w2", 128, 64),
        ("wmu", 64, latent_dim), ("wlv", 64, latent_dim),
        ("w4", latent_dim, 64), ("w5", 64, 128), ("w6", 128, input_dim),
    ]
    params = {}
    keys = jax.random.split(key, len(dims))
    for k, (name, fan_in, fan_out) in zip(keys, dims):
        bound = 1.0 / jnp.sqrt(fan_in)
        wk, bk = jax.random.split(k)
        params[name] = jax.random.uniform(
            wk, (fan_in, fan_out), jnp.float32, -bound, bound)
        params[name.replace("w", "b", 1)] = jax.random.uniform(
            bk, (1, fan_out), jnp.float32, -bound, bound)
    return params


def vae_forward(x, eps, params, *, max_bm=512):
    B, D = x.shape
    L = eps.shape[1]
    f32, bf16 = jnp.float32, jnp.bfloat16

    # lane padding: every feature dim becomes a multiple of 128
    Dp = _round_up(D, LANE)
    Lp = _round_up(L, LANE)
    Hp = 128  # hidden dims 128 and 64 both pad to 128

    # batch tiling (sublane-aligned, capped for VMEM on v7x)
    bm = min(max_bm, _round_up(B, SUBLANE))
    Bp = _round_up(B, bm)
    grid = (Bp // bm,)

    # pad activation streams (zero rows/cols keep the math exact)
    x_p = _pad2d(x.astype(f32), Bp, Dp)
    eps_p = _pad2d(eps.astype(f32), Bp, Lp)

    # pad weights to lane-dense shapes, cast to bf16 for the MXU; biases stay f32
    def w(name, rows, cols):
        return _pad2d(params[name], rows, cols).astype(bf16)

    def b(name, cols):
        return _pad2d(params[name], 1, cols).astype(f32)

    operands = [
        x_p, eps_p,
        w("w1", Dp, Hp),  b("b1", Hp),
        w("w2", Hp, Hp),  b("b2", Hp),
        w("wmu", Hp, Lp), b("bmu", Lp),
        w("wlv", Hp, Lp), b("blv", Lp),
        w("w4", Lp, Hp),  b("b4", Hp),
        w("w5", Hp, Hp),  b("b5", Hp),
        w("w6", Hp, Dp),  b("b6", Dp),
    ]

    def batch_spec(cols):
        return pl.BlockSpec((bm, cols), lambda i: (i, 0))

    def resident_spec(shape):
        return pl.BlockSpec(shape, lambda i: (0, 0))

    in_specs = [batch_spec(Dp), batch_spec(Lp)]
    in_specs += [resident_spec(op.shape) for op in operands[2:]]

    out_specs = (batch_spec(Dp), batch_spec(Lp), batch_spec(Lp))
    out_shape = (
        jax.ShapeDtypeStruct((Bp, Dp), f32),
        jax.ShapeDtypeStruct((Bp, Lp), f32),
        jax.ShapeDtypeStruct((Bp, Lp), f32),
    )

    # explicit VMEM budget: double-buffered streams + resident weights + headroom,
    # capped well below v7x's 64 MiB physical VMEM.
    stream_bytes = 2 * bm * (2 * Dp + 3 * Lp) * 4
    weight_bytes = 2 * sum(int(o.size) * o.dtype.itemsize for o in operands[2:])
    vmem_limit = int(min(56 * 2**20, max(8 * 2**20, 4 * (stream_bytes + weight_bytes))))

    recon_p, mu_p, logvar_p = pl.pallas_call(
        vae_kernel,
        grid=grid,
        in_specs=in_specs,
        out_specs=out_specs,
        out_shape=out_shape,
        compiler_params=pltpu.CompilerParams(
            dimension_semantics=("parallel",),
            vmem_limit_bytes=vmem_limit,
        ),
    )(*operands)

    return recon_p[:B, :D], mu_p[:B, :L], logvar_p[:B, :L]


def vae_forward_ref(x, eps, params):
    """Pure-JAX reference mirroring the kernel math (bf16 MXU inputs, f32 accum)."""
    f32, bf16 = jnp.float32, jnp.bfloat16

    def lin(a, w, b):
        return jnp.dot(a.astype(bf16), w.astype(bf16), preferred_element_type=f32) + b

    h = jax.nn.relu(lin(x, params["w1"], params["b1"]))
    h = jax.nn.relu(lin(h, params["w2"], params["b2"]))
    mu = lin(h, params["wmu"], params["bmu"])
    logvar = lin(h, params["wlv"], params["blv"])
    z = mu + eps * jnp.exp(0.5 * logvar)
    d = jax.nn.relu(lin(z, params["w4"], params["b4"]))
    d = jax.nn.relu(lin(d, params["w5"], params["b5"]))
    return lin(d, params["w6"], params["b6"]), mu, logvar


if __name__ == "__main__":
    B, INPUT_DIM, LATENT_DIM = 8, 16, 32

    key = jax.random.PRNGKey(0)
    k_param, k_x, k_eps = jax.random.split(key, 3)

    params = init_params(k_param, INPUT_DIM, LATENT_DIM)
    x = jax.random.normal(k_x, (B, INPUT_DIM), jnp.float32)
    eps = jax.random.normal(k_eps, (B, LATENT_DIM), jnp.float32)

    recon, mu, logvar = vae_forward(x, eps, params)
    jax.block_until_ready((recon, mu, logvar))

    # sanity check against pure-JAX reference (same bf16-matmul math)
    r_ref, mu_ref, lv_ref = vae_forward_ref(x, eps, params)
    assert jnp.allclose(recon, r_ref, atol=2e-2, rtol=2e-2)
    assert jnp.allclose(mu, mu_ref, atol=2e-2, rtol=2e-2)
    assert jnp.allclose(logvar, lv_ref, atol=2e-2, rtol=2e-2)

    print("KERNEL_OK")
</pallas_src>

<mosaic_0001>
module attributes {stable_mosaic.version = 11 : i64} {
  func.func @vae_kernel(%arg0: i32, %arg1: memref<8x128xf32, #tpu.memory_space<vmem>>, %arg2: memref<8x128xf32, #tpu.memory_space<vmem>>, %arg3: memref<128x128xbf16, #tpu.memory_space<vmem>>, %arg4: memref<1x128xf32, #tpu.memory_space<vmem>>, %arg5: memref<128x128xbf16, #tpu.memory_space<vmem>>, %arg6: memref<1x128xf32, #tpu.memory_space<vmem>>, %arg7: memref<128x128xbf16, #tpu.memory_space<vmem>>, %arg8: memref<1x128xf32, #tpu.memory_space<vmem>>, %arg9: memref<128x128xbf16, #tpu.memory_space<vmem>>, %arg10: memref<1x128xf32, #tpu.memory_space<vmem>>, %arg11: memref<128x128xbf16, #tpu.memory_space<vmem>>, %arg12: memref<1x128xf32, #tpu.memory_space<vmem>>, %arg13: memref<128x128xbf16, #tpu.memory_space<vmem>>, %arg14: memref<1x128xf32, #tpu.memory_space<vmem>>, %arg15: memref<128x128xbf16, #tpu.memory_space<vmem>>, %arg16: memref<1x128xf32, #tpu.memory_space<vmem>>, %arg17: memref<8x128xf32, #tpu.memory_space<vmem>>, %arg18: memref<8x128xf32, #tpu.memory_space<vmem>>, %arg19: memref<8x128xf32, #tpu.memory_space<vmem>>) attributes {dimension_semantics = [#tpu.dimension_semantics<parallel>], iteration_bounds = array<i64: 1>, scalar_prefetch = 0 : i64, scratch_operands = 0 : i64, tpu.core_type = #tpu.core_type<tc>, window_params = [{transform_indices = @transform_0, window_bounds = array<i64: 8, 128>}, {transform_indices = @transform_1, window_bounds = array<i64: 8, 128>}, {pipeline_mode = #tpu.pipeline_mode<synchronous>, transform_indices = @transform_2, window_bounds = array<i64: 128, 128>}, {pipeline_mode = #tpu.pipeline_mode<synchronous>, transform_indices = @transform_3, window_bounds = array<i64: 1, 128>}, {pipeline_mode = #tpu.pipeline_mode<synchronous>, transform_indices = @transform_4, window_bounds = array<i64: 128, 128>}, {pipeline_mode = #tpu.pipeline_mode<synchronous>, transform_indices = @transform_5, window_bounds = array<i64: 1, 128>}, {pipeline_mode = #tpu.pipeline_mode<synchronous>, transform_indices = @transform_6, window_bounds = array<i64: 128, 128>}, {pipeline_mode = #tpu.pipeline_mode<synchronous>, transform_indices = @transform_7, window_bounds = array<i64: 1, 128>}, {pipeline_mode = #tpu.pipeline_mode<synchronous>, transform_indices = @transform_8, window_bounds = array<i64: 128, 128>}, {pipeline_mode = #tpu.pipeline_mode<synchronous>, transform_indices = @transform_9, window_bounds = array<i64: 1, 128>}, {pipeline_mode = #tpu.pipeline_mode<synchronous>, transform_indices = @transform_10, window_bounds = array<i64: 128, 128>}, {pipeline_mode = #tpu.pipeline_mode<synchronous>, transform_indices = @transform_11, window_bounds = array<i64: 1, 128>}, {pipeline_mode = #tpu.pipeline_mode<synchronous>, transform_indices = @transform_12, window_bounds = array<i64: 128, 128>}, {pipeline_mode = #tpu.pipeline_mode<synchronous>, transform_indices = @transform_13, window_bounds = array<i64: 1, 128>}, {pipeline_mode = #tpu.pipeline_mode<synchronous>, transform_indices = @transform_14, window_bounds = array<i64: 128, 128>}, {pipeline_mode = #tpu.pipeline_mode<synchronous>, transform_indices = @transform_15, window_bounds = array<i64: 1, 128>}, {transform_indices = @transform_16, window_bounds = array<i64: 8, 128>}, {transform_indices = @transform_17, window_bounds = array<i64: 8, 128>}, {transform_indices = @transform_18, window_bounds = array<i64: 8, 128>}]} {
    %c0 = arith.constant 0 : index
    %c0_0 = arith.constant 0 : index
    %0 = vector.load %arg1[%c0, %c0_0] : memref<8x128xf32, #tpu.memory_space<vmem>>, vector<8x128xf32>
    %1 = arith.truncf %0 : vector<8x128xf32> to vector<8x128xbf16>
    %c0_1 = arith.constant 0 : index
    %c0_2 = arith.constant 0 : index
    %2 = vector.load %arg3[%c0_1, %c0_2] : memref<128x128xbf16, #tpu.memory_space<vmem>>, vector<128x128xbf16>
    %cst = arith.constant dense<0.000000e+00> : vector<8x128xf32>
    %3 = tpu.matmul %1, %2, %cst {dimension_numbers = #tpu.dot_dimension_numbers<[1], [0], [0], [1], [0, 0, 1, 1], [], []>} : vector<8x128xbf16>, vector<128x128xbf16>, vector<8x128xf32> -> vector<8x128xf32>
    %c0_3 = arith.constant 0 : index
    %c0_4 = arith.constant 0 : index
    %4 = vector.load %arg4[%c0_3, %c0_4] : memref<1x128xf32, #tpu.memory_space<vmem>>, vector<1x128xf32>
    %5 = vector.broadcast %4 : vector<1x128xf32> to vector<8x128xf32>
    %6 = arith.addf %3, %5 : vector<8x128xf32>
    %cst_5 = arith.constant 0.000000e+00 : f32
    %7 = vector.broadcast %cst_5 : f32 to vector<8x128xf32>
    %8 = arith.maximumf %6, %7 : vector<8x128xf32>
    %9 = arith.truncf %8 : vector<8x128xf32> to vector<8x128xbf16>
    %c0_6 = arith.constant 0 : index
    %c0_7 = arith.constant 0 : index
    %10 = vector.load %arg5[%c0_6, %c0_7] : memref<128x128xbf16, #tpu.memory_space<vmem>>, vector<128x128xbf16>
    %cst_8 = arith.constant dense<0.000000e+00> : vector<8x128xf32>
    %11 = tpu.matmul %9, %10, %cst_8 {dimension_numbers = #tpu.dot_dimension_numbers<[1], [0], [0], [1], [0, 0, 1, 1], [], []>} : vector<8x128xbf16>, vector<128x128xbf16>, vector<8x128xf32> -> vector<8x128xf32>
    %c0_9 = arith.constant 0 : index
    %c0_10 = arith.constant 0 : index
    %12 = vector.load %arg6[%c0_9, %c0_10] : memref<1x128xf32, #tpu.memory_space<vmem>>, vector<1x128xf32>
    %13 = vector.broadcast %12 : vector<1x128xf32> to vector<8x128xf32>
    %14 = arith.addf %11, %13 : vector<8x128xf32>
    %cst_11 = arith.constant 0.000000e+00 : f32
    %15 = vector.broadcast %cst_11 : f32 to vector<8x128xf32>
    %16 = arith.maximumf %14, %15 : vector<8x128xf32>
    %17 = arith.truncf %16 : vector<8x128xf32> to vector<8x128xbf16>
    %c0_12 = arith.constant 0 : index
    %c0_13 = arith.constant 0 : index
    %18 = vector.load %arg7[%c0_12, %c0_13] : memref<128x128xbf16, #tpu.memory_space<vmem>>, vector<128x128xbf16>
    %cst_14 = arith.constant dense<0.000000e+00> : vector<8x128xf32>
    %19 = tpu.matmul %17, %18, %cst_14 {dimension_numbers = #tpu.dot_dimension_numbers<[1], [0], [0], [1], [0, 0, 1, 1], [], []>} : vector<8x128xbf16>, vector<128x128xbf16>, vector<8x128xf32> -> vector<8x128xf32>
    %c0_15 = arith.constant 0 : index
    %c0_16 = arith.constant 0 : index
    %20 = vector.load %arg8[%c0_15, %c0_16] : memref<1x128xf32, #tpu.memory_space<vmem>>, vector<1x128xf32>
    %21 = vector.broadcast %20 : vector<1x128xf32> to vector<8x128xf32>
    %22 = arith.addf %19, %21 : vector<8x128xf32>
    %23 = arith.truncf %16 : vector<8x128xf32> to vector<8x128xbf16>
    %c0_17 = arith.constant 0 : index
    %c0_18 = arith.constant 0 : index
    %24 = vector.load %arg9[%c0_17, %c0_18] : memref<128x128xbf16, #tpu.memory_space<vmem>>, vector<128x128xbf16>
    %cst_19 = arith.constant dense<0.000000e+00> : vector<8x128xf32>
    %25 = tpu.matmul %23, %24, %cst_19 {dimension_numbers = #tpu.dot_dimension_numbers<[1], [0], [0], [1], [0, 0, 1, 1], [], []>} : vector<8x128xbf16>, vector<128x128xbf16>, vector<8x128xf32> -> vector<8x128xf32>
    %c0_20 = arith.constant 0 : index
    %c0_21 = arith.constant 0 : index
    %26 = vector.load %arg10[%c0_20, %c0_21] : memref<1x128xf32, #tpu.memory_space<vmem>>, vector<1x128xf32>
    %27 = vector.broadcast %26 : vector<1x128xf32> to vector<8x128xf32>
    %28 = arith.addf %25, %27 : vector<8x128xf32>
    %c0_22 = arith.constant 0 : index
    %c0_23 = arith.constant 0 : index
    %29 = vector.load %arg2[%c0_22, %c0_23] : memref<8x128xf32, #tpu.memory_space<vmem>>, vector<8x128xf32>
    %cst_24 = arith.constant 5.000000e-01 : f32
    %30 = vector.broadcast %cst_24 : f32 to vector<8x128xf32>
    %31 = arith.mulf %30, %28 : vector<8x128xf32>
    %32 = math.exp %31 : vector<8x128xf32>
    %33 = arith.mulf %29, %32 : vector<8x128xf32>
    %34 = arith.addf %22, %33 : vector<8x128xf32>
    %35 = arith.truncf %34 : vector<8x128xf32> to vector<8x128xbf16>
    %c0_25 = arith.constant 0 : index
    %c0_26 = arith.constant 0 : index
    %36 = vector.load %arg11[%c0_25, %c0_26] : memref<128x128xbf16, #tpu.memory_space<vmem>>, vector<128x128xbf16>
    %cst_27 = arith.constant dense<0.000000e+00> : vector<8x128xf32>
    %37 = tpu.matmul %35, %36, %cst_27 {dimension_numbers = #tpu.dot_dimension_numbers<[1], [0], [0], [1], [0, 0, 1, 1], [], []>} : vector<8x128xbf16>, vector<128x128xbf16>, vector<8x128xf32> -> vector<8x128xf32>
    %c0_28 = arith.constant 0 : index
    %c0_29 = arith.constant 0 : index
    %38 = vector.load %arg12[%c0_28, %c0_29] : memref<1x128xf32, #tpu.memory_space<vmem>>, vector<1x128xf32>
    %39 = vector.broadcast %38 : vector<1x128xf32> to vector<8x128xf32>
    %40 = arith.addf %37, %39 : vector<8x128xf32>
    %cst_30 = arith.constant 0.000000e+00 : f32
    %41 = vector.broadcast %cst_30 : f32 to vector<8x128xf32>
    %42 = arith.maximumf %40, %41 : vector<8x128xf32>
    %43 = arith.truncf %42 : vector<8x128xf32> to vector<8x128xbf16>
    %c0_31 = arith.constant 0 : index
    %c0_32 = arith.constant 0 : index
    %44 = vector.load %arg13[%c0_31, %c0_32] : memref<128x128xbf16, #tpu.memory_space<vmem>>, vector<128x128xbf16>
    %cst_33 = arith.constant dense<0.000000e+00> : vector<8x128xf32>
    %45 = tpu.matmul %43, %44, %cst_33 {dimension_numbers = #tpu.dot_dimension_numbers<[1], [0], [0], [1], [0, 0, 1, 1], [], []>} : vector<8x128xbf16>, vector<128x128xbf16>, vector<8x128xf32> -> vector<8x128xf32>
    %c0_34 = arith.constant 0 : index
    %c0_35 = arith.constant 0 : index
    %46 = vector.load %arg14[%c0_34, %c0_35] : memref<1x128xf32, #tpu.memory_space<vmem>>, vector<1x128xf32>
    %47 = vector.broadcast %46 : vector<1x128xf32> to vector<8x128xf32>
    %48 = arith.addf %45, %47 : vector<8x128xf32>
    %cst_36 = arith.constant 0.000000e+00 : f32
    %49 = vector.broadcast %cst_36 : f32 to vector<8x128xf32>
    %50 = arith.maximumf %48, %49 : vector<8x128xf32>
    %51 = arith.truncf %50 : vector<8x128xf32> to vector<8x128xbf16>
    %c0_37 = arith.constant 0 : index
    %c0_38 = arith.constant 0 : index
    %52 = vector.load %arg15[%c0_37, %c0_38] : memref<128x128xbf16, #tpu.memory_space<vmem>>, vector<128x128xbf16>
    %cst_39 = arith.constant dense<0.000000e+00> : vector<8x128xf32>
    %53 = tpu.matmul %51, %52, %cst_39 {dimension_numbers = #tpu.dot_dimension_numbers<[1], [0], [0], [1], [0, 0, 1, 1], [], []>} : vector<8x128xbf16>, vector<128x128xbf16>, vector<8x128xf32> -> vector<8x128xf32>
    %c0_40 = arith.constant 0 : index
    %c0_41 = arith.constant 0 : index
    %54 = vector.load %arg16[%c0_40, %c0_41] : memref<1x128xf32, #tpu.memory_space<vmem>>, vector<1x128xf32>
    %55 = vector.broadcast %54 : vector<1x128xf32> to vector<8x128xf32>
    %56 = arith.addf %53, %55 : vector<8x128xf32>
    %c0_42 = arith.constant 0 : index
    %c0_43 = arith.constant 0 : index
    %57 = vector.load %arg17[%c0_42, %c0_43] : memref<8x128xf32, #tpu.memory_space<vmem>>, vector<8x128xf32>
    tpu.vector_store %arg17[%c0_42, %c0_43], %56 {strides = array<i32>} : memref<8x128xf32, #tpu.memory_space<vmem>>, vector<8x128xf32>,
    %c0_44 = arith.constant 0 : index
    %c0_45 = arith.constant 0 : index
    %58 = vector.load %arg18[%c0_44, %c0_45] : memref<8x128xf32, #tpu.memory_space<vmem>>, vector<8x128xf32>
    tpu.vector_store %arg18[%c0_44, %c0_45], %22 {strides = array<i32>} : memref<8x128xf32, #tpu.memory_space<vmem>>, vector<8x128xf32>,
    %c0_46 = arith.constant 0 : index
    %c0_47 = arith.constant 0 : index
    %59 = vector.load %arg19[%c0_46, %c0_47] : memref<8x128xf32, #tpu.memory_space<vmem>>, vector<8x128xf32>
    tpu.vector_store %arg19[%c0_46, %c0_47], %28 {strides = array<i32>} : memref<8x128xf32, #tpu.memory_space<vmem>>, vector<8x128xf32>,
    return
  }
  func.func @transform_0(%arg0: i32) -> (i32, i32) {
    %c0_i32 = arith.constant 0 : i32
    %c0_i32_0 = arith.constant 0 : i32
    return %arg0, %c0_i32 : i32, i32
  }
  func.func @transform_1(%arg0: i32) -> (i32, i32) {
    %c0_i32 = arith.constant 0 : i32
    %c0_i32_0 = arith.constant 0 : i32
    return %arg0, %c0_i32 : i32, i32
  }
  func.func @transform_2(%arg0: i32) -> (i32, i32) {
    %c0_i32 = arith.constant 0 : i32
    %c0_i32_0 = arith.constant 0 : i32
    %c0_i32_1 = arith.constant 0 : i32
    return %c0_i32, %c0_i32_0 : i32, i32
  }
  func.func @transform_3(%arg0: i32) -> (i32, i32) {
    %c0_i32 = arith.constant 0 : i32
    %c0_i32_0 = arith.constant 0 : i32
    %c0_i32_1 = arith.constant 0 : i32
    return %c0_i32, %c0_i32_0 : i32, i32
  }
  func.func @transform_4(%arg0: i32) -> (i32, i32) {
    %c0_i32 = arith.constant 0 : i32
    %c0_i32_0 = arith.constant 0 : i32
    %c0_i32_1 = arith.constant 0 : i32
    return %c0_i32, %c0_i32_0 : i32, i32
  }
  func.func @transform_5(%arg0: i32) -> (i32, i32) {
    %c0_i32 = arith.constant 0 : i32
    %c0_i32_0 = arith.constant 0 : i32
    %c0_i32_1 = arith.constant 0 : i32
    return %c0_i32, %c0_i32_0 : i32, i32
  }
  func.func @transform_6(%arg0: i32) -> (i32, i32) {
    %c0_i32 = arith.constant 0 : i32
    %c0_i32_0 = arith.constant 0 : i32
    %c0_i32_1 = arith.constant 0 : i32
    return %c0_i32, %c0_i32_0 : i32, i32
  }
  func.func @transform_7(%arg0: i32) -> (i32, i32) {
    %c0_i32 = arith.constant 0 : i32
    %c0_i32_0 = arith.constant 0 : i32
    %c0_i32_1 = arith.constant 0 : i32
    return %c0_i32, %c0_i32_0 : i32, i32
  }
  func.func @transform_8(%arg0: i32) -> (i32, i32) {
    %c0_i32 = arith.constant 0 : i32
    %c0_i32_0 = arith.constant 0 : i32
    %c0_i32_1 = arith.constant 0 : i32
    return %c0_i32, %c0_i32_0 : i32, i32
  }
  func.func @transform_9(%arg0: i32) -> (i32, i32) {
    %c0_i32 = arith.constant 0 : i32
    %c0_i32_0 = arith.constant 0 : i32
    %c0_i32_1 = arith.constant 0 : i32
    return %c0_i32, %c0_i32_0 : i32, i32
  }
  func.func @transform_10(%arg0: i32) -> (i32, i32) {
    %c0_i32 = arith.constant 0 : i32
    %c0_i32_0 = arith.constant 0 : i32
    %c0_i32_1 = arith.constant 0 : i32
    return %c0_i32, %c0_i32_0 : i32, i32
  }
  func.func @transform_11(%arg0: i32) -> (i32, i32) {
    %c0_i32 = arith.constant 0 : i32
    %c0_i32_0 = arith.constant 0 : i32
    %c0_i32_1 = arith.constant 0 : i32
    return %c0_i32, %c0_i32_0 : i32, i32
  }
  func.func @transform_12(%arg0: i32) -> (i32, i32) {
    %c0_i32 = arith.constant 0 : i32
    %c0_i32_0 = arith.constant 0 : i32
    %c0_i32_1 = arith.constant 0 : i32
    return %c0_i32, %c0_i32_0 : i32, i32
  }
  func.func @transform_13(%arg0: i32) -> (i32, i32) {
    %c0_i32 = arith.constant 0 : i32
    %c0_i32_0 = arith.constant 0 : i32
    %c0_i32_1 = arith.constant 0 : i32
    return %c0_i32, %c0_i32_0 : i32, i32
  }
  func.func @transform_14(%arg0: i32) -> (i32, i32) {
    %c0_i32 = arith.constant 0 : i32
    %c0_i32_0 = arith.constant 0 : i32
    %c0_i32_1 = arith.constant 0 : i32
    return %c0_i32, %c0_i32_0 : i32, i32
  }
  func.func @transform_15(%arg0: i32) -> (i32, i32) {
    %c0_i32 = arith.constant 0 : i32
    %c0_i32_0 = arith.constant 0 : i32
    %c0_i32_1 = arith.constant 0 : i32
    return %c0_i32, %c0_i32_0 : i32, i32
  }
  func.func @transform_16(%arg0: i32) -> (i32, i32) {
    %c0_i32 = arith.constant 0 : i32
    %c0_i32_0 = arith.constant 0 : i32
    return %arg0, %c0_i32 : i32, i32
  }
  func.func @transform_17(%arg0: i32) -> (i32, i32) {
    %c0_i32 = arith.constant 0 : i32
    %c0_i32_0 = arith.constant 0 : i32
    return %arg0, %c0_i32 : i32, i32
  }
  func.func @transform_18(%arg0: i32) -> (i32, i32) {
    %c0_i32 = arith.constant 0 : i32
    %c0_i32_0 = arith.constant 0 : i32
    return %arg0, %c0_i32 : i32, i32
  }
}

</mosaic_0001>

<bundles_post_ra>
// kernel: tpu_custom_call.1
= control target key start
LH: loop header
LB: loop body
LE: loop exit
PB: predicated region body
PF: predicated region fallthrough
CT: control target
= control target key end

     0   :  { %s2005_s0 = inlined_call_operand.hbm [shape: f32[8,128], index: 0, kind: input, shape index: {}]   ;;  %s2006_s1 = inlined_call_operand.hbm [shape: f32[8,128], index: 1, kind: input, shape index: {}]   ;;  %s2007_s2 = inlined_call_operand.hbm [shape: bf16[128,128], index: 2, kind: input, shape index: {}]   ;;  %s2008_s3 = inlined_call_operand.vmem [shape: f32[1,128], index: 3, kind: input, shape index: {}]   ;;  %s2009_s4 = inlined_call_operand.hbm [shape: bf16[128,128], index: 4, kind: input, shape index: {}]   ;;  %s2010_s5 = inlined_call_operand.vmem [shape: f32[1,128], index: 5, kind: input, shape index: {}]   ;;  %s2011_s6 = inlined_call_operand.hbm [shape: bf16[128,128], index: 6, kind: input, shape index: {}]   ;;  %s2012_s7 = inlined_call_operand.vmem [shape: f32[1,128], index: 7, kind: input, shape index: {}]   ;;  %s2013_s8 = inlined_call_operand.hbm [shape: bf16[128,128], index: 8, kind: input, shape index: {}]   ;;  %s2014_s9 = inlined_call_operand.vmem [shape: f32[1,128], index: 9, kind: input, shape index: {}]   ;;  %s2015_s10 = inlined_call_operand.hbm [shape: bf16[128,128], index: 10, kind: input, shape index: {}]   ;;  %s2016_s11 = inlined_call_operand.vmem [shape: f32[1,128], index: 11, kind: input, shape index: {}]   ;;  %s2017_s12 = inlined_call_operand.hbm [shape: bf16[128,128], index: 12, kind: input, shape index: {}]   ;;  %s2018_s13 = inlined_call_operand.vmem [shape: f32[1,128], index: 13, kind: input, shape index: {}]   ;;  %s2019_s14 = inlined_call_operand.hbm [shape: bf16[128,128], index: 14, kind: input, shape index: {}]   ;;  %s2020_s15 = inlined_call_operand.vmem [shape: f32[1,128], index: 15, kind: input, shape index: {}]   ;;  %s2021_s16 = inlined_call_operand.hbm [shape: f32[8,128], index: 16, kind: output, shape index: {0}]   ;;  %s2022_s17 = inlined_call_operand.hbm [shape: f32[8,128], index: 17, kind: output, shape index: {1}]   ;;  %s2023_s18 = inlined_call_operand.hbm [shape: f32[8,128], index: 18, kind: output, shape index: {2}]  }
   0x1   :  { %2027 = sst [smem:[#allocation28_spill]] %s2005_s0 }
   0x2   :  { %2028 = sst [smem:[#allocation29_spill]] %s2006_s1 }
   0x3   :  { %2029 = sst [smem:[#allocation30_spill]] %s2007_s2 }
   0x4   :  { %24 = vsyncpa [#allocation3], 0 }
   0x5   :  { %25 = vsyncpa [#allocation6], 0 }
   0x6   :  { %26 = vsyncpa [#allocation9], 0 }
   0x7   :  { %27 = vsyncpa [#allocation12], 0 }
   0x8   :  { %28 = vsyncpa [#allocation15], 0 }
   0x9   :  { %29 = vsyncpa [#allocation4], 0 }
   0xa   :  { %30 = vsyncpa [#allocation19], 0  ;;  %s1638_s27 = smov [#allocation5]   ;;  %s2030_s0 = sld [smem:[#allocation29_spill]] }
   0xb   :  { %s47_s28 = sshll.u32 %s1638_s27, 4  ;;  %s48_s28 = int_to_ptr.vmem [resolvable:$true] %s47_s28 }
  0x10   :  { %s1360_s19 = scalar_lea.hbm %s2030_s0, 128 }
  0x11   :  { %p1361_p0 = scmp.ne.s32.totalorder %s2030_s0, %s1360_s19  ;;  %p1364_p1 = scmp.lt.u32.totalorder %s1360_s19, %s2030_s0 }
  0x13   :  { %p1366_p2 = pnand %p1364_p1, %p1361_p0 }
  0x15   :  { %1369 = shalt.err (!%p1366_p2)
}
  0x16   :  { %s1370_s2 = scalar_lea.vmem %s48_s28, 128  ;;  %p1375_p4 = scmp.lt.s32.totalorder %s48_s28, %s48_s28 }
  0x17   :  { %p1371_p3 = scmp.ne.s32.totalorder %s48_s28, %s1370_s2  ;;  %p1376_p5 = scmp.lt.s32.totalorder %s1370_s2, %s1370_s2 }
  0x19   :  { %p1377_p6 = por %p1376_p5, %p1375_p4 }
  0x1b   :  { %p1378_p7 = pnand %p1377_p6, %p1371_p3 }
  0x1d   :  { %1381 = shalt.err (!%p1378_p7)
}
  0x1e   :  { %50 = dma.hbm_to_vmem [thread:$0]  %s2030_s0, 128, %s48_s28, [#allocation6]  }
  0x1f   :  { %s1639_s25 = smov [#allocation8]   ;;  %s1640_s27 = smov [#allocation11]  }
  0x20   :  { %s70_s26 = sshll.u32 %s1639_s25, 4  ;;  %s98_s29 = sshll.u32 %s1640_s27, 4  ;;  %s71_s26 = int_to_ptr.vmem [resolvable:$true] %s70_s26  ;;  %s99_s29 = int_to_ptr.vmem [resolvable:$true] %s98_s29 }
  0x21   :  { %s1382_s1 = scalar_lea.hbm %s2009_s4, 1024 }
  0x22   :  { %p1383_p8 = scmp.ne.s32.totalorder %s2009_s4, %s1382_s1  ;;  %p1386_p9 = scmp.lt.u32.totalorder %s1382_s1, %s2009_s4 }
  0x24   :  { %p1388_p10 = pnand %p1386_p9, %p1383_p8 }
  0x26   :  { %1391 = shalt.err (!%p1388_p10)
}
  0x27   :  { %s1392_s28 = scalar_lea.vmem %s71_s26, 1024  ;;  %p1397_p12 = scmp.lt.s32.totalorder %s71_s26, %s71_s26 }
  0x28   :  { %p1393_p11 = scmp.ne.s32.totalorder %s71_s26, %s1392_s28  ;;  %p1398_p13 = scmp.lt.s32.totalorder %s1392_s28, %s1392_s28 }
  0x2a   :  { %p1399_p0 = por %p1398_p13, %p1397_p12 }
  0x2c   :  { %p1400_p1 = pnand %p1399_p0, %p1393_p11 }
  0x2e   :  { %1403 = shalt.err (!%p1400_p1)
}
  0x2f   :  { %s1641_s0 = smov 64   ;;  %s1642_s23 = smov 4  }
  0x30   :  { %76 = dma.hbm_to_vmem [thread:$0]  %s2009_s4, 1024, %s71_s26, [#allocation9], %s1641_s0, %s1641_s0, %s1642_s23  }
  0x31   :  { %s1404_s19 = scalar_lea.hbm %s2013_s8, 1024 }
  0x32   :  { %p1405_p2 = scmp.ne.s32.totalorder %s2013_s8, %s1404_s19  ;;  %p1408_p3 = scmp.lt.u32.totalorder %s1404_s19, %s2013_s8 }
  0x34   :  { %p1410_p4 = pnand %p1408_p3, %p1405_p2 }
  0x36   :  { %1413 = shalt.err (!%p1410_p4)
}
  0x37   :  { %s1414_s2 = scalar_lea.vmem %s99_s29, 1024  ;;  %p1419_p6 = scmp.lt.s32.totalorder %s99_s29, %s99_s29 }
  0x38   :  { %p1415_p5 = scmp.ne.s32.totalorder %s99_s29, %s1414_s2  ;;  %p1420_p7 = scmp.lt.s32.totalorder %s1414_s2, %s1414_s2 }
  0x3a   :  { %p1421_p8 = por %p1420_p7, %p1419_p6 }
  0x3c   :  { %p1422_p9 = pnand %p1421_p8, %p1415_p5 }
  0x3e   :  { %1425 = shalt.err (!%p1422_p9)
}
  0x3f   :  { %104 = dma.hbm_to_vmem [thread:$0]  %s2013_s8, 1024, %s99_s29, [#allocation12], %s1641_s0, %s1641_s0, %s1642_s23  }
  0x40   :  { %s1643_s28 = smov [#allocation14]   ;;  %s1644_s25 = smov [#allocation2]  }
  0x41   :  { %s126_s24 = sshll.u32 %s1643_s28, 4  ;;  %s37_s27 = sshll.u32 %s1644_s25, 4  ;;  %s127_s24 = int_to_ptr.vmem [resolvable:$true] %s126_s24  ;;  %s38_s27 = int_to_ptr.vmem [resolvable:$true] %s37_s27 }
  0x42   :  { %s1426_s1 = scalar_lea.hbm %s2017_s12, 1024 }
  0x43   :  { %p1427_p10 = scmp.ne.s32.totalorder %s2017_s12, %s1426_s1  ;;  %p1430_p11 = scmp.lt.u32.totalorder %s1426_s1, %s2017_s12 }
  0x45   :  { %p1432_p12 = pnand %p1430_p11, %p1427_p10 }
  0x47   :  { %1435 = shalt.err (!%p1432_p12)
}
  0x48   :  { %s1436_s8 = scalar_lea.vmem %s127_s24, 1024  ;;  %p1441_p0 = scmp.lt.s32.totalorder %s127_s24, %s127_s24 }
  0x49   :  { %p1437_p13 = scmp.ne.s32.totalorder %s127_s24, %s1436_s8  ;;  %p1442_p1 = scmp.lt.s32.totalorder %s1436_s8, %s1436_s8 }
  0x4b   :  { %p1443_p2 = por %p1442_p1, %p1441_p0 }
  0x4d   :  { %p1444_p3 = pnand %p1443_p2, %p1437_p13 }
  0x4f   :  { %1447 = shalt.err (!%p1444_p3)
}
  0x50   :  { %132 = dma.hbm_to_vmem [thread:$0]  %s2017_s12, 1024, %s127_s24, [#allocation15], %s1641_s0, %s1641_s0, %s1642_s23  }
  0x51   :  { %s2031_s25 = sld [smem:[#allocation28_spill]] }
  0x57   :  { %s1448_s30 = scalar_lea.hbm %s2031_s25, 128 }
  0x58   :  { %p1449_p4 = scmp.ne.s32.totalorder %s2031_s25, %s1448_s30  ;;  %p1452_p5 = scmp.lt.u32.totalorder %s1448_s30, %s2031_s25 }
  0x5a   :  { %p1454_p6 = pnand %p1452_p5, %p1449_p4 }
  0x5c   :  { %1457 = shalt.err (!%p1454_p6)
}
  0x5d   :  { %s1458_s22 = scalar_lea.vmem %s38_s27, 128  ;;  %p1463_p8 = scmp.lt.s32.totalorder %s38_s27, %s38_s27 }
  0x5e   :  { %p1459_p7 = scmp.ne.s32.totalorder %s38_s27, %s1458_s22  ;;  %p1464_p9 = scmp.lt.s32.totalorder %s1458_s22, %s1458_s22 }
  0x60   :  { %p1465_p10 = por %p1464_p9, %p1463_p8 }
  0x62   :  { %p1466_p11 = pnand %p1465_p10, %p1459_p7 }
  0x64   :  { %1469 = shalt.err (!%p1466_p11)
}
  0x65   :  { %40 = dma.hbm_to_vmem [thread:$0]  %s2031_s25, 128, %s38_s27, [#allocation3]  }
  0x66   :  { %s1645_s2 = smov [#allocation7]   ;;  %s1646_s29 = smov [#allocation10]  }
  0x67   :  { %s56_s8 = sshll.u32 %s1645_s2, 4  ;;  %s84_s4 = sshll.u32 %s1646_s29, 4  ;;  %s57_s8 = int_to_ptr.vmem [resolvable:$true] %s56_s8  ;;  %s85_s4 = int_to_ptr.vmem [resolvable:$true] %s84_s4 }
  0x68   :  { %s2032_s30 = sld [smem:[#allocation30_spill]] }
  0x6e   :  { %s1470_s19 = scalar_lea.hbm %s2032_s30, 1024 }
  0x6f   :  { %p1471_p12 = scmp.ne.s32.totalorder %s2032_s30, %s1470_s19  ;;  %p1474_p13 = scmp.lt.u32.totalorder %s1470_s19, %s2032_s30 }
  0x71   :  { %p1476_p0 = pnand %p1474_p13, %p1471_p12 }
  0x73   :  { %1479 = shalt.err (!%p1476_p0)
}
  0x74   :  { %s1480_s27 = scalar_lea.vmem %s57_s8, 1024  ;;  %p1485_p2 = scmp.lt.s32.totalorder %s57_s8, %s57_s8 }
  0x75   :  { %p1481_p1 = scmp.ne.s32.totalorder %s57_s8, %s1480_s27  ;;  %p1486_p3 = scmp.lt.s32.totalorder %s1480_s27, %s1480_s27 }
  0x77   :  { %p1487_p4 = por %p1486_p3, %p1485_p2 }
  0x79   :  { %p1488_p5 = pnand %p1487_p4, %p1481_p1 }
  0x7b   :  { %1491 = shalt.err (!%p1488_p5)
}
  0x7c   :  { %62 = dma.hbm_to_vmem [thread:$0]  %s2032_s30, 1024, %s57_s8, [#allocation6], %s1641_s0, %s1641_s0, %s1642_s23  }
  0x7d   :  { %s1492_s29 = scalar_lea.hbm %s2011_s6, 1024 }
  0x7e   :  { %p1493_p6 = scmp.ne.s32.totalorder %s2011_s6, %s1492_s29  ;;  %p1496_p7 = scmp.lt.u32.totalorder %s1492_s29, %s2011_s6 }
  0x80   :  { %p1498_p8 = pnand %p1496_p7, %p1493_p6 }
  0x82   :  { %1501 = shalt.err (!%p1498_p8)
}
  0x83   :  { %s1502_s20 = scalar_lea.vmem %s85_s4, 1024  ;;  %p1507_p10 = scmp.lt.s32.totalorder %s85_s4, %s85_s4 }
  0x84   :  { %p1503_p9 = scmp.ne.s32.totalorder %s85_s4, %s1502_s20  ;;  %p1508_p11 = scmp.lt.s32.totalorder %s1502_s20, %s1502_s20 }
  0x86   :  { %p1509_p12 = por %p1508_p11, %p1507_p10 }
  0x88   :  { %p1510_p13 = pnand %p1509_p12, %p1503_p9 }
  0x8a   :  { %1513 = shalt.err (!%p1510_p13)
}
  0x8b   :  { %90 = dma.hbm_to_vmem [thread:$0]  %s2011_s6, 1024, %s85_s4, [#allocation9], %s1641_s0, %s1641_s0, %s1642_s23  }
  0x8c   :  { %s1647_s21 = smov [#allocation13]   ;;  %s1648_s27 = smov [#allocation16]  }
  0x8d   :  { %s112_s22 = sshll.u32 %s1647_s21, 4  ;;  %s140_s25 = sshll.u32 %s1648_s27, 4  ;;  %s113_s22 = int_to_ptr.vmem [resolvable:$true] %s112_s22  ;;  %s141_s25 = int_to_ptr.vmem [resolvable:$true] %s140_s25 }
  0x8e   :  { %s1514_s2 = scalar_lea.hbm %s2015_s10, 1024 }
  0x8f   :  { %p1515_p0 = scmp.ne.s32.totalorder %s2015_s10, %s1514_s2  ;;  %p1518_p1 = scmp.lt.u32.totalorder %s1514_s2, %s2015_s10 }
  0x91   :  { %p1520_p2 = pnand %p1518_p1, %p1515_p0 }
  0x93   :  { %1523 = shalt.err (!%p1520_p2)
}
  0x94   :  { %s1524_s6 = scalar_lea.vmem %s113_s22, 1024  ;;  %p1529_p4 = scmp.lt.s32.totalorder %s113_s22, %s113_s22 }
  0x95   :  { %p1525_p3 = scmp.ne.s32.totalorder %s113_s22, %s1524_s6  ;;  %p1530_p5 = scmp.lt.s32.totalorder %s1524_s6, %s1524_s6 }
  0x97   :  { %p1531_p6 = por %p1530_p5, %p1529_p4 }
  0x99   :  { %p1532_p7 = pnand %p1531_p6, %p1525_p3 }
  0x9b   :  { %1535 = shalt.err (!%p1532_p7)
}
  0x9c   :  { %118 = dma.hbm_to_vmem [thread:$0]  %s2015_s10, 1024, %s113_s22, [#allocation12], %s1641_s0, %s1641_s0, %s1642_s23  }
  0x9d   :  { %s1536_s30 = scalar_lea.hbm %s2019_s14, 1024 }
  0x9e   :  { %p1537_p8 = scmp.ne.s32.totalorder %s2019_s14, %s1536_s30  ;;  %p1540_p9 = scmp.lt.u32.totalorder %s1536_s30, %s2019_s14 }
  0xa0   :  { %p1542_p10 = pnand %p1540_p9, %p1537_p8 }
  0xa2   :  { %1545 = shalt.err (!%p1542_p10)
}
  0xa3   :  { %s1546_s2 = scalar_lea.vmem %s141_s25, 1024  ;;  %p1551_p12 = scmp.lt.s32.totalorder %s141_s25, %s141_s25 }
  0xa4   :  { %p1547_p11 = scmp.ne.s32.totalorder %s141_s25, %s1546_s2  ;;  %p1552_p13 = scmp.lt.s32.totalorder %s1546_s2, %s1546_s2 }
  0xa6   :  { %p1553_p0 = por %p1552_p13, %p1551_p12 }
  0xa8   :  { %p1554_p1 = pnand %p1553_p0, %p1547_p11 }
  0xaa   :  { %1557 = shalt.err (!%p1554_p1)
}
  0xab   :  { %146 = dma.hbm_to_vmem [thread:$0]  %s2019_s14, 1024, %s141_s25, [#allocation15], %s1641_s0, %s1641_s0, %s1642_s23  }
  0xac   :  { %1624 = dma.done.wait [#allocation3], 128  }
  0xad   :  { %1625 = vsyncadd [#allocation3], 4294967168 }
  0xae   :  { %1626 = dma.done.wait [#allocation6], 1152  }
  0xaf   :  { %1627 = vsyncadd [#allocation6], 4294966144 }
  0xb0   :  { %1628 = dma.done.wait [#allocation9], 2048  }
  0xb1   :  { %1629 = vsyncadd [#allocation9], 4294965248 }
  0xb2   :  { %1630 = dma.done.wait [#allocation12], 2048  }
  0xb3   :  { %1631 = vsyncadd [#allocation12], 4294965248 }
  0xb4   :  { %1632 = dma.done.wait [#allocation15], 2048  }
  0xb5   :  { %1633 = vsyncadd [#allocation15], 4294965248  ;;  %v1649_v0 = vmov 0.0   ;;  %vm1650_vm0 = vmmov 0   ;;  %v1302_v1 = vld [vmem:[#allocation7] sm:$0xff]   ;;  %v1303_v2 = vld [vmem:[#allocation7 + $0x8] sm:$0xff]  }
  0xb6   :  { %1146 = vmatprep.subr.bf16.mxu0 %v1649_v0  ;;  %1162 = vmatprep.mubr.msk.bf16.mxu0 %vm1650_vm0, %v1649_v0  ;;  %v1304_v3 = vld [vmem:[#allocation7 + $0x10] sm:$0xff]   ;;  %v1310_v4 = vld [vmem:[#allocation8] sm:$0xff]   ;;  %v1305_v5 = vld [vmem:[#allocation7 + $0x18] sm:$0xff]  }
  0xb7   :  { %1166 = vmatprep.subr.bf16.mxu1 %v1649_v0  ;;  %1182 = vmatprep.mubr.msk.bf16.mxu1 %vm1650_vm0, %v1649_v0  ;;  %v1311_v6 = vld [vmem:[#allocation8 + $0x8] sm:$0xff]   ;;  %v1306_v7 = vld [vmem:[#allocation7 + $0x20] sm:$0xff]   ;;  %v1312_v8 = vld [vmem:[#allocation8 + $0x10] sm:$0xff]  }
  0xb8   :  { %1147 = vmatpush3.bf16.msra.mxu0 %v1302_v1  ;;  %1167 = vmatpush3.bf16.msra.mxu1 %v1310_v4  ;;  %v1307_v9 = vld [vmem:[#allocation7 + $0x28] sm:$0xff]   ;;  %v1313_v10 = vld [vmem:[#allocation8 + $0x18] sm:$0xff]   ;;  %v1308_v11 = vld [vmem:[#allocation7 + $0x30] sm:$0xff]  }
  0xb9   :  { %1148 = vmatprep.subr.bf16.mxu0 %v1649_v0  ;;  %1168 = vmatprep.subr.bf16.mxu1 %v1649_v0  ;;  %v1314_v12 = vld [vmem:[#allocation8 + $0x20] sm:$0xff]   ;;  %v1309_v13 = vld [vmem:[#allocation7 + $0x38] sm:$0xff]   ;;  %v177_v14 = vld [vmem:[#allocation2] sm:$0xff] }
  0xba   :  { %v1315_v15 = vld [vmem:[#allocation8 + $0x28] sm:$0xff]   ;;  %v178_v16 = vpack.c.bf16 %v177_v14, %v177_v14  ;;  %v1316_v17 = vld [vmem:[#allocation8 + $0x30] sm:$0xff]   ;;  %v1317_v18 = vld [vmem:[#allocation8 + $0x38] sm:$0xff]  }
  0xbb   :  { %v1318_v19 = vld [vmem:[#allocation10] sm:$0xff]   ;;  %v1320_v20 = vld [vmem:[#allocation10 + $0x8] sm:$0xff]   ;;  %v1322_v21 = vld [vmem:[#allocation10 + $0x10] sm:$0xff]  }
  0xbc   :  { %1149 = vmatpush3.bf16.msra.mxu0 %v1303_v2  ;;  %1169 = vmatpush3.bf16.msra.mxu1 %v1311_v6  ;;  %v1324_v22 = vld [vmem:[#allocation10 + $0x18] sm:$0xff]   ;;  %v1326_v23 = vld [vmem:[#allocation10 + $0x20] sm:$0xff]   ;;  %v1328_v24 = vld [vmem:[#allocation10 + $0x28] sm:$0xff]  }
  0xbd   :  { %1150 = vmatprep.subr.bf16.mxu0 %v1649_v0  ;;  %1170 = vmatprep.subr.bf16.mxu1 %v1649_v0  ;;  %v1020_v25 = vld [vmem:[%s2008_s3] ss:$0 sm:$0xff]  ;;  %v1319_v32 = vld [vmem:[#allocation11] sm:$0xff]   ;;  %v1321_v34 = vld [vmem:[#allocation11 + $0x8] sm:$0xff]  }
  0xbe   :  { %v1323_v35 = vld [vmem:[#allocation11 + $0x10] sm:$0xff]   ;;  %v1325_v36 = vld [vmem:[#allocation11 + $0x18] sm:$0xff]   ;;  %v1327_v37 = vld [vmem:[#allocation11 + $0x20] sm:$0xff]  }
  0xbf   :  { %v1329_v38 = vld [vmem:[#allocation11 + $0x28] sm:$0xff]   ;;  %v1330_v39 = vld [vmem:[#allocation10 + $0x30] sm:$0xff]   ;;  %v1332_v41 = vld [vmem:[#allocation10 + $0x38] sm:$0xff]  }
  0xc0   :  { %1151 = vmatpush3.bf16.msra.mxu0 %v1304_v3  ;;  %1171 = vmatpush3.bf16.msra.mxu1 %v1312_v8  ;;  %v1331_v40 = vld [vmem:[#allocation11 + $0x30] sm:$0xff]   ;;  %v1333_v42 = vld [vmem:[#allocation11 + $0x38] sm:$0xff]   ;;  %v1334_v50 = vld [vmem:[#allocation13] sm:$0xff]  }
  0xc1   :  { %1152 = vmatprep.subr.bf16.mxu0 %v1649_v0  ;;  %1172 = vmatprep.subr.bf16.mxu1 %v1649_v0  ;;  %v1029_v43 = vld [vmem:[%s2010_s5] ss:$0 sm:$0xff]  ;;  %v1335_v52 = vld [vmem:[#allocation13 + $0x8] sm:$0xff]   ;;  %v1337_v54 = vld [vmem:[#allocation13 + $0x18] sm:$0xff]  }
  0xc2   :  { %v1336_v53 = vld [vmem:[#allocation13 + $0x10] sm:$0xff]   ;;  %v1338_v55 = vld [vmem:[#allocation13 + $0x20] sm:$0xff]   ;;  %v1339_v56 = vld [vmem:[#allocation13 + $0x28] sm:$0xff]  }
  0xc3   :  { %v1340_v57 = vld [vmem:[#allocation13 + $0x30] sm:$0xff]   ;;  %v1341_v58 = vld [vmem:[#allocation13 + $0x38] sm:$0xff]   ;;  %v1342_v59 = vld [vmem:[#allocation14] sm:$0xff]  }
  0xc4   :  { %1153 = vmatpush3.bf16.msra.mxu0 %v1305_v5  ;;  %1173 = vmatpush3.bf16.msra.mxu1 %v1313_v10  ;;  %v1343_v60 = vld [vmem:[#allocation14 + $0x8] sm:$0xff]   ;;  %v1344_v61 = vld [vmem:[#allocation14 + $0x10] sm:$0xff]   ;;  %v1345_v62 = vld [vmem:[#allocation14 + $0x18] sm:$0xff]  }
  0xc5   :  { %1154 = vmatprep.subr.bf16.mxu0 %v1649_v0  ;;  %1174 = vmatprep.subr.bf16.mxu1 %v1649_v0  ;;  %v1346_v63 = vld [vmem:[#allocation14 + $0x20] sm:$0xff]   ;;  %v1347_v1 = vld [vmem:[#allocation14 + $0x28] sm:$0xff]   ;;  %v1038_v2 = vld [vmem:[%s2012_s7] ss:$0 sm:$0xff] }
  0xc6   :  { %v1047_v3 = vld [vmem:[%s2014_s9] ss:$0 sm:$0xff] }
  0xc8   :  { %1155 = vmatpush3.bf16.msra.mxu0 %v1306_v7  ;;  %1175 = vmatpush3.bf16.msra.mxu1 %v1314_v12 }
  0xc9   :  { %1156 = vmatprep.subr.bf16.mxu0 %v1649_v0  ;;  %1176 = vmatprep.subr.bf16.mxu1 %v1649_v0 }
  0xcc   :  { %1157 = vmatpush3.bf16.msra.mxu0 %v1307_v9  ;;  %1177 = vmatpush3.bf16.msra.mxu1 %v1315_v15 }
  0xcd   :  { %1158 = vmatprep.subr.bf16.mxu0 %v1649_v0  ;;  %1178 = vmatprep.subr.bf16.mxu1 %v1649_v0 }
  0xd0   :  { %1159 = vmatpush3.bf16.msra.mxu0 %v1308_v11  ;;  %1179 = vmatpush3.bf16.msra.mxu1 %v1316_v17 }
  0xd1   :  { %1160 = vmatprep.subr.bf16.mxu0 %v1649_v0  ;;  %1180 = vmatprep.subr.bf16.mxu1 %v1649_v0 }
  0xd4   :  { %1161 = vmatpush3.bf16.msra.mxu0 %v1309_v13  ;;  %1181 = vmatpush3.bf16.msra.mxu1 %v1317_v18 }
  0xd5   :  { %1186 = vmatprep.subr.bf16.mxu0 %v1649_v0  ;;  %1206 = vmatprep.subr.bf16.mxu1 %v1649_v0 }
  0xd7   :  { %1163 = vmatmul.mubr.bf16.vlgmr.msra.gmra.mrb[0].mxu0 %v178_v16  ;;  %v627_v16 = vld [vmem:[#allocation5] sm:$0xff] }
  0xd8   :  { %1202 = vmatprep.mubr.msk.bf16.mxu0 %vm1650_vm0, %v1649_v0  ;;  %1187 = vmatpush3.bf16.msra.mxu0 %v1318_v19 }
  0xd9   :  { %1188 = vmatprep.subr.bf16.mxu0 %v1649_v0 }
  0xdc   :  { %1189 = vmatpush3.bf16.msra.mxu0 %v1320_v20 }
  0xdd   :  { %1190 = vmatprep.subr.bf16.mxu0 %v1649_v0 }
  0xe0   :  { %1191 = vmatpush3.bf16.msra.mxu0 %v1322_v21  ;;  %v1348_v21 = vld [vmem:[#allocation14 + $0x30] sm:$0xff]  }
  0xe1   :  { %1192 = vmatprep.subr.bf16.mxu0 %v1649_v0 }
  0xe4   :  { %1193 = vmatpush3.bf16.msra.mxu0 %v1324_v22  ;;  %v1349_v22 = vld [vmem:[#allocation14 + $0x38] sm:$0xff]  }
  0xe5   :  { %1194 = vmatprep.subr.bf16.mxu0 %v1649_v0 }
  0xe8   :  { %1195 = vmatpush3.bf16.msra.mxu0 %v1326_v23  ;;  %v1350_v23 = vld [vmem:[#allocation16] sm:$0xff]  }
  0xe9   :  { %1196 = vmatprep.subr.bf16.mxu0 %v1649_v0 }
  0xec   :  { %1197 = vmatpush3.bf16.msra.mxu0 %v1328_v24  ;;  %v1351_v24 = vld [vmem:[#allocation16 + $0x8] sm:$0xff]  }
  0xed   :  { %1198 = vmatprep.subr.bf16.mxu0 %v1649_v0 }
  0xf0   :  { %1199 = vmatpush3.bf16.msra.mxu0 %v1330_v39  ;;  %v1065_v39 = vld [vmem:[%s2018_s13] ss:$0 sm:$0xff] }
  0xf1   :  { %1200 = vmatprep.subr.bf16.mxu0 %v1649_v0 }
  0xf4   :  { %1201 = vmatpush3.bf16.msra.mxu0 %v1332_v41 }
  0xf5   :  { %1226 = vmatprep.subr.bf16.mxu0 %v1649_v0 }
 0x1aa   :  { %v284_v26 = vpop.f32.mrb[0].mxu0 }
 0x1ab   :  { %v285_v27 = vadd.f32 %v1020_v25, %v284_v26  ;;  %v1164_v28 = vpop.f32.mrb[1].mxu0  ;;  %v1352_v25 = vld [vmem:[#allocation16 + $0x10] sm:$0xff]   ;;  %v1353_v26 = vld [vmem:[#allocation16 + $0x18] sm:$0xff]  }
 0x1ac   :  { %v287_v29 = vpop.f32.mrb[2].mxu0  ;;  %v1355_v28 = vld [vmem:[#allocation16 + $0x28] sm:$0xff]  }
 0x1ad   :  { %v290_v30 = vmax.f32 %v285_v27, 0.0  ;;  %v1165_v31 = vpop.f32.mrb[3].mxu0  ;;  %v1354_v27 = vld [vmem:[#allocation16 + $0x20] sm:$0xff]   ;;  %v1056_v29 = vld [vmem:[%s2016_s11] ss:$0 sm:$0xff]  ;;  %s1651_s11 = smov [#allocation18]  }
 0x1ae   :  { %s990_s6 = sshll.u32 %s1651_s11, 4  ;;  %s991_s6 = int_to_ptr.vmem [resolvable:$true] %s990_s6 }
 0x1af   :  { %v291_v33 = vpack.c.bf16 %v290_v30, %v290_v30  ;;  %s1558_s4 = scalar_lea.vmem %s991_s6, 128  ;;  %p1563_p3 = scmp.lt.s32.totalorder %s991_s6, %s991_s6 }
 0x1b0   :  { %p1559_p2 = scmp.ne.s32.totalorder %s991_s6, %s1558_s4  ;;  %p1564_p4 = scmp.lt.s32.totalorder %s1558_s4, %s1558_s4 }
 0x1b1   :  { %1183 = vmatmul.mubr.bf16.vlgmr.msra.gmra.mrb[0].mxu1 %v291_v33 }
 0x1b2   :  { %1207 = vmatpush3.bf16.msra.mxu1 %v1319_v32  ;;  %1222 = vmatprep.mubr.msk.bf16.mxu1 %vm1650_vm0, %v1649_v0  ;;  %p1565_p5 = por %p1564_p4, %p1563_p3 }
 0x1b3   :  { %1208 = vmatprep.subr.bf16.mxu1 %v1649_v0 }
 0x1b4   :  { %p1566_p6 = pnand %p1565_p5, %p1559_p2 }
 0x1b6   :  { %1209 = vmatpush3.bf16.msra.mxu1 %v1321_v34 }
 0x1b7   :  { %1210 = vmatprep.subr.bf16.mxu1 %v1649_v0 }
 0x1ba   :  { %1211 = vmatpush3.bf16.msra.mxu1 %v1323_v35 }
 0x1bb   :  { %1212 = vmatprep.subr.bf16.mxu1 %v1649_v0 }
 0x1be   :  { %1213 = vmatpush3.bf16.msra.mxu1 %v1325_v36 }
 0x1bf   :  { %1214 = vmatprep.subr.bf16.mxu1 %v1649_v0 }
 0x1c2   :  { %1215 = vmatpush3.bf16.msra.mxu1 %v1327_v37  ;;  %v1356_v37 = vld [vmem:[#allocation16 + $0x30] sm:$0xff]  }
 0x1c3   :  { %1216 = vmatprep.subr.bf16.mxu1 %v1649_v0 }
 0x1c6   :  { %1217 = vmatpush3.bf16.msra.mxu1 %v1329_v38  ;;  %v1357_v38 = vld [vmem:[#allocation16 + $0x38] sm:$0xff]  }
 0x1c7   :  { %1218 = vmatprep.subr.bf16.mxu1 %v1649_v0 }
 0x1ca   :  { %1219 = vmatpush3.bf16.msra.mxu1 %v1331_v40 }
 0x1cb   :  { %1220 = vmatprep.subr.bf16.mxu1 %v1649_v0 }
 0x1ce   :  { %1221 = vmatpush3.bf16.msra.mxu1 %v1333_v42 }
 0x1cf   :  { %1246 = vmatprep.subr.bf16.mxu1 %v1649_v0 }
 0x284   :  { %v397_v44 = vpop.f32.mrb[0].mxu1 }
 0x285   :  { %v398_v45 = vadd.f32 %v1029_v43, %v397_v44  ;;  %v1184_v46 = vpop.f32.mrb[1].mxu1 }
 0x286   :  { %v400_v47 = vpop.f32.mrb[2].mxu1 }
 0x287   :  { %v403_v48 = vmax.f32 %v398_v45, 0.0  ;;  %v1185_v49 = vpop.f32.mrb[3].mxu1 }
 0x289   :  { %v404_v51 = vpack.c.bf16 %v403_v48, %v403_v48 }
 0x28b   :  { %1203 = vmatmul.mubr.bf16.vlgmr.msra.gmra.mrb[4].mxu0 %v404_v51  ;;  %1223 = vmatmul.mubr.bf16.vlgmr.msra.gmra.mrb[4].mxu1 %v404_v51 }
 0x28c   :  { %1227 = vmatpush3.bf16.msra.mxu0 %v1334_v50  ;;  %1242 = vmatprep.mubr.msk.bf16.mxu0 %vm1650_vm0, %v1649_v0 }
 0x28d   :  { %1228 = vmatprep.subr.bf16.mxu0 %v1649_v0  ;;  %1262 = vmatprep.mubr.msk.bf16.mxu1 %vm1650_vm0, %v1649_v0 }
 0x28e   :  { %1247 = vmatpush3.bf16.msra.mxu1 %v1342_v59 }
 0x28f   :  { %1248 = vmatprep.subr.bf16.mxu1 %v1649_v0 }
 0x290   :  { %1229 = vmatpush3.bf16.msra.mxu0 %v1335_v52 }
 0x291   :  { %1230 = vmatprep.subr.bf16.mxu0 %v1649_v0 }
 0x292   :  { %1249 = vmatpush3.bf16.msra.mxu1 %v1343_v60 }
 0x293   :  { %1250 = vmatprep.subr.bf16.mxu1 %v1649_v0 }
 0x294   :  { %1231 = vmatpush3.bf16.msra.mxu0 %v1336_v53 }
 0x295   :  { %1232 = vmatprep.subr.bf16.mxu0 %v1649_v0 }
 0x296   :  { %1251 = vmatpush3.bf16.msra.mxu1 %v1344_v61 }
 0x297   :  { %1252 = vmatprep.subr.bf16.mxu1 %v1649_v0 }
 0x298   :  { %1233 = vmatpush3.bf16.msra.mxu0 %v1337_v54 }
 0x299   :  { %1234 = vmatprep.subr.bf16.mxu0 %v1649_v0 }
 0x29a   :  { %1253 = vmatpush3.bf16.msra.mxu1 %v1345_v62 }
 0x29b   :  { %1254 = vmatprep.subr.bf16.mxu1 %v1649_v0 }
 0x29c   :  { %1235 = vmatpush3.bf16.msra.mxu0 %v1338_v55 }
 0x29d   :  { %1236 = vmatprep.subr.bf16.mxu0 %v1649_v0 }
 0x29e   :  { %1255 = vmatpush3.bf16.msra.mxu1 %v1346_v63 }
 0x29f   :  { %1256 = vmatprep.subr.bf16.mxu1 %v1649_v0 }
 0x2a0   :  { %1237 = vmatpush3.bf16.msra.mxu0 %v1339_v56 }
 0x2a1   :  { %1238 = vmatprep.subr.bf16.mxu0 %v1649_v0 }
 0x2a2   :  { %1257 = vmatpush3.bf16.msra.mxu1 %v1347_v1 }
 0x2a3   :  { %1258 = vmatprep.subr.bf16.mxu1 %v1649_v0 }
 0x2a4   :  { %1239 = vmatpush3.bf16.msra.mxu0 %v1340_v57 }
 0x2a5   :  { %1240 = vmatprep.subr.bf16.mxu0 %v1649_v0 }
 0x2a6   :  { %1259 = vmatpush3.bf16.msra.mxu1 %v1348_v21 }
 0x2a7   :  { %1260 = vmatprep.subr.bf16.mxu1 %v1649_v0 }
 0x2a8   :  { %1241 = vmatpush3.bf16.msra.mxu0 %v1341_v58 }
 0x2a9   :  { %1266 = vmatprep.subr.bf16.mxu0 %v1649_v0 }
 0x2aa   :  { %1261 = vmatpush3.bf16.msra.mxu1 %v1349_v22 }
 0x35e   :  { %v510_v4 = vpop.f32.mrb[4].mxu0  ;;  %v621_v5 = vpop.f32.mrb[4].mxu1 }
 0x35f   :  { %v511_v6 = vadd.f32 %v1038_v2, %v510_v4  ;;  %v622_v7 = vadd.f32 %v1047_v3, %v621_v5  ;;  %v1204_v8 = vpop.f32.mrb[5].mxu0  ;;  %v1224_v9 = vpop.f32.mrb[5].mxu1 }
 0x360   :  { %v513_v10 = vpop.f32.mrb[6].mxu0  ;;  %v624_v11 = vpop.f32.mrb[6].mxu1 }
 0x361   :  { %972 = vst [vmem:[#allocation18] sm:$0xff] %v511_v6  ;;  %v628_v12 = vmul.f32 0.5, %v622_v7  ;;  %973 = vst [vmem:[#allocation20] sm:$0xff] %v622_v7  ;;  %v1205_v13 = vpop.f32.mrb[7].mxu0  ;;  %v1225_v14 = vpop.f32.mrb[7].mxu1 }
 0x363   :  { %v629_v15 = vmul.f32 1.442695, %v628_v12 }
 0x365   :  { %1358 = vpow2.f32 %v629_v15 }
 0x36f   :  { %v1359_v17 = vpop.eup %1358 }
 0x370   :  { %v631_v18 = vmul.f32 %v1359_v17, %v627_v16 }
 0x372   :  { %v632_v19 = vadd.f32 %v631_v18, %v511_v6 }
 0x374   :  { %v633_v20 = vpack.c.bf16 %v632_v19, %v632_v19 }
 0x376   :  { %1243 = vmatmul.mubr.bf16.vlgmr.msra.gmra.mrb[8].mxu0 %v633_v20 }
 0x377   :  { %1282 = vmatprep.mubr.msk.bf16.mxu0 %vm1650_vm0, %v1649_v0  ;;  %1267 = vmatpush3.bf16.msra.mxu0 %v1350_v23 }
 0x378   :  { %1268 = vmatprep.subr.bf16.mxu0 %v1649_v0 }
 0x37b   :  { %1269 = vmatpush3.bf16.msra.mxu0 %v1351_v24 }
 0x37c   :  { %1270 = vmatprep.subr.bf16.mxu0 %v1649_v0 }
 0x37f   :  { %1271 = vmatpush3.bf16.msra.mxu0 %v1352_v25 }
 0x380   :  { %1272 = vmatprep.subr.bf16.mxu0 %v1649_v0 }
 0x383   :  { %1273 = vmatpush3.bf16.msra.mxu0 %v1353_v26 }
 0x384   :  { %1274 = vmatprep.subr.bf16.mxu0 %v1649_v0 }
 0x387   :  { %1275 = vmatpush3.bf16.msra.mxu0 %v1354_v27 }
 0x388   :  { %1276 = vmatprep.subr.bf16.mxu0 %v1649_v0 }
 0x38b   :  { %1277 = vmatpush3.bf16.msra.mxu0 %v1355_v28 }
 0x38c   :  { %1278 = vmatprep.subr.bf16.mxu0 %v1649_v0 }
 0x38f   :  { %1279 = vmatpush3.bf16.msra.mxu0 %v1356_v37 }
 0x390   :  { %1280 = vmatprep.subr.bf16.mxu0 %v1649_v0 }
 0x393   :  { %1281 = vmatpush3.bf16.msra.mxu0 %v1357_v38 }
 0x449   :  { %v739_v30 = vpop.f32.mrb[8].mxu0 }
 0x44a   :  { %v740_v31 = vadd.f32 %v1056_v29, %v739_v30  ;;  %v1244_v32 = vpop.f32.mrb[9].mxu0 }
 0x44b   :  { %v742_v33 = vpop.f32.mrb[10].mxu0 }
 0x44c   :  { %v745_v34 = vmax.f32 %v740_v31, 0.0  ;;  %v1245_v35 = vpop.f32.mrb[11].mxu0 }
 0x44e   :  { %v746_v36 = vpack.c.bf16 %v745_v34, %v745_v34 }
 0x450   :  { %1263 = vmatmul.mubr.bf16.vlgmr.msra.gmra.mrb[8].mxu1 %v746_v36 }
 0x523   :  { %v852_v40 = vpop.f32.mrb[8].mxu1 }
 0x524   :  { %v853_v41 = vadd.f32 %v1065_v39, %v852_v40  ;;  %v1264_v42 = vpop.f32.mrb[9].mxu1 }
 0x525   :  { %v855_v43 = vpop.f32.mrb[10].mxu1 }
 0x526   :  { %v858_v44 = vmax.f32 %v853_v41, 0.0  ;;  %v1265_v45 = vpop.f32.mrb[11].mxu1 }
 0x528   :  { %v859_v46 = vpack.c.bf16 %v858_v44, %v858_v44 }
 0x52a   :  { %1283 = vmatmul.mubr.bf16.vlgmr.msra.gmra.mrb[12].mxu0 %v859_v46 }
 0x52b   :  { %1569 = shalt.err (!%p1566_p6)
}
 0x52c   :  { %s1570_s20 = scalar_lea.hbm %s2022_s17, 128 }
 0x52d   :  { %p1571_p7 = scmp.ne.s32.totalorder %s2022_s17, %s1570_s20  ;;  %p1574_p8 = scmp.lt.u32.totalorder %s1570_s20, %s2022_s17 }
 0x52f   :  { %p1576_p9 = pnand %p1574_p8, %p1571_p7 }
 0x531   :  { %1579 = shalt.err (!%p1576_p9)
}
 0x532   :  { %993 = dma.vmem_to_hbm [thread:$0]  %s991_s6, 128, %s2022_s17, [#allocation19]  }
 0x533   :  { %s1652_s2 = smov [#allocation20]  }
 0x534   :  { %s1000_s10 = sshll.u32 %s1652_s2, 4  ;;  %s1001_s10 = int_to_ptr.vmem [resolvable:$true] %s1000_s10 }
 0x535   :  { %s1580_s22 = scalar_lea.vmem %s1001_s10, 128  ;;  %p1585_p11 = scmp.lt.s32.totalorder %s1001_s10, %s1001_s10 }
 0x536   :  { %p1581_p10 = scmp.ne.s32.totalorder %s1001_s10, %s1580_s22  ;;  %p1586_p12 = scmp.lt.s32.totalorder %s1580_s22, %s1580_s22 }
 0x538   :  { %p1587_p13 = por %p1586_p12, %p1585_p11 }
 0x53a   :  { %p1588_p0 = pnand %p1587_p13, %p1581_p10 }
 0x53c   :  { %1591 = shalt.err (!%p1588_p0)
}
 0x53d   :  { %s1592_s3 = scalar_lea.hbm %s2023_s18, 128 }
 0x53e   :  { %p1593_p1 = scmp.ne.s32.totalorder %s2023_s18, %s1592_s3  ;;  %p1596_p2 = scmp.lt.u32.totalorder %s1592_s3, %s2023_s18 }
 0x540   :  { %p1598_p3 = pnand %p1596_p2, %p1593_p1 }
 0x542   :  { %1601 = shalt.err (!%p1598_p3)
}
 0x543   :  { %1003 = dma.vmem_to_hbm [thread:$0]  %s1001_s10, 128, %s2023_s18, [#allocation19]   ;;  %v1074_v0 = vld [vmem:[%s2020_s15] ss:$0 sm:$0xff] }
 0x544   :  { %s1653_s28 = smov [#allocation17]  }
 0x545   :  { %s980_s19 = sshll.u32 %s1653_s28, 4  ;;  %s981_s19 = int_to_ptr.vmem [resolvable:$true] %s980_s19 }
 0x546   :  { %s1602_s11 = scalar_lea.vmem %s981_s19, 128  ;;  %p1607_p5 = scmp.lt.s32.totalorder %s981_s19, %s981_s19 }
 0x547   :  { %p1603_p4 = scmp.ne.s32.totalorder %s981_s19, %s1602_s11  ;;  %p1608_p6 = scmp.lt.s32.totalorder %s1602_s11, %s1602_s11 }
 0x549   :  { %p1609_p7 = por %p1608_p6, %p1607_p5 }
 0x54b   :  { %p1610_p8 = pnand %p1609_p7, %p1603_p4 }
 0x5fd   :  { %v965_v47 = vpop.f32.mrb[12].mxu0 }
 0x5fe   :  { %v966_v48 = vadd.f32 %v1074_v0, %v965_v47  ;;  %v1284_v49 = vpop.f32.mrb[13].mxu0 }
 0x5ff   :  { %v968_v50 = vpop.f32.mrb[14].mxu0 }
 0x600   :  { %971 = vst [vmem:[#allocation17] sm:$0xff] %v966_v48  ;;  %v1285_v51 = vpop.f32.mrb[15].mxu0 }
 0x601   :  { %1613 = shalt.err (!%p1610_p8)
}
 0x602   :  { %s1614_s15 = scalar_lea.hbm %s2021_s16, 128 }
 0x603   :  { %p1615_p9 = scmp.ne.s32.totalorder %s2021_s16, %s1614_s15  ;;  %p1618_p10 = scmp.lt.u32.totalorder %s1614_s15, %s2021_s16 }
 0x605   :  { %p1620_p11 = pnand %p1618_p10, %p1615_p9 }
 0x607   :  { %1623 = shalt.err (!%p1620_p11)
}
 0x608   :  { %983 = dma.vmem_to_hbm [thread:$0]  %s981_s19, 128, %s2021_s16, [#allocation4]  }
 0x609   :  { %1634 = dma.done.wait [#allocation4], 128  }
 0x60a   :  { %1635 = vsyncadd [#allocation4], 4294967168 }
 0x60b   :  { %1636 = dma.done.wait [#allocation19], 256  }
 0x60c   :  { %1637 = vsyncadd [#allocation19], 4294967040 }
 0x60d   :  { %1013 = vsyncpa [#allocation3], 1 }
 0x60e   :  { %1014 = vsyncpa [#allocation6], 1 }
 0x60f   :  { %1015 = vsyncpa [#allocation9], 1 }
 0x610   :  { %1016 = vsyncpa [#allocation12], 1 }
 0x611   :  { %1017 = vsyncpa [#allocation15], 1 }
 0x612   :  { %1018 = vsyncpa [#allocation4], 1 }
 0x613   :  { %1019 = vsyncpa [#allocation19], 1 }

</bundles_post_ra>
